<compile_context>
chip_gen: v7x
topology: tpu7x:2x2x1
jax: 0.10.0
libtpu: 0.0.40
codegen_flags: <defaults>
</compile_context>

<pallas_src>
import functools

import jax
import jax.numpy as jnp
from jax.experimental import pallas as pl
from jax.experimental.pallas import tpu as pltpu

EPS = 1e-5


# ---------------------------------------------------------------------------
# Fused backbone-proxy (1x1 conv + swish) + global (avg+max)/2 pooling.
# Grid = (batch, spatial tiles); the feature map never touches HBM.
# ---------------------------------------------------------------------------
def stem_pool_kernel(x_ref, wt_ref, b_ref, o_ref, sum_acc, max_acc, *, inv_hw):
    s = pl.program_id(1)

    @pl.when(s == 0)
    def _init():
        sum_acc[...] = jnp.zeros_like(sum_acc)
        max_acc[...] = jnp.full_like(max_acc, -jnp.inf)

    x = x_ref[...]            # (Cin, TILE_S) f32, channels-first (native NCHW)
    wt = wt_ref[...]          # (Cout, Cin)
    cin = x.shape[0]

    # 1x1 conv as Cin broadcast-FMA accumulations on the VPU (K is tiny; the
    # 256-wide MXU contraction would be ~98% idle at K=4).
    y = wt[:, 0:1] * x[0:1, :]                       # (Cout, TILE_S)
    for c in range(1, cin):
        y = y + wt[:, c:c + 1] * x[c:c + 1, :]
    y = y + b_ref[...]                               # bias (Cout, 1) broadcasts
    y = y * jax.nn.sigmoid(y)                        # swish, f32 (v5e-safe)

    sum_acc[...] += jnp.sum(y, axis=1, keepdims=True)          # (Cout, 1)
    max_acc[...] = jnp.maximum(max_acc[...],
                               jnp.max(y, axis=1, keepdims=True))

    @pl.when(s == pl.num_programs(1) - 1)
    def _finalize():
        o_ref[...] = (sum_acc[...] * inv_hw + max_acc[...]) * 0.5


def fused_stem_pool(x_nchw, w, b, *, tile_s=128):
    B, Cin, H, W = x_nchw.shape
    Cout = w.shape[1]
    HW = H * W
    tile_s = min(tile_s, HW)
    assert HW % tile_s == 0, "spatial extent must be divisible by the tile"
    n_s = HW // tile_s

    x3 = x_nchw.reshape(B, Cin, HW)       # pure reshape of NCHW: no copy
    w_t = jnp.transpose(w)                # (Cout, Cin) — tiny, trace time
    b_col = b.reshape(Cout, 1)

    kernel = functools.partial(stem_pool_kernel, inv_hw=1.0 / HW)
    out = pl.pallas_call(
        kernel,
        out_shape=jax.ShapeDtypeStruct((B, Cout, 1), jnp.float32),
        grid_spec=pltpu.PrefetchScalarGridSpec(
            num_scalar_prefetch=0,
            grid=(B, n_s),
            in_specs=[
                pl.BlockSpec((None, Cin, tile_s), lambda bb, ss: (bb, 0, ss)),
                pl.BlockSpec((Cout, Cin), lambda bb, ss: (0, 0)),
                pl.BlockSpec((Cout, 1), lambda bb, ss: (0, 0)),
            ],
            out_specs=pl.BlockSpec((None, Cout, 1), lambda bb, ss: (bb, 0, 0)),
            scratch_shapes=[pltpu.VMEM((Cout, 1), jnp.float32),
                            pltpu.VMEM((Cout, 1), jnp.float32)],
        ),
        compiler_params=pltpu.CompilerParams(
            dimension_semantics=("parallel", "arbitrary")),
    )(x3, w_t, b_col)
    return out.reshape(B, Cout)


# ---------------------------------------------------------------------------
# All three CNN_Heads in one kernel: BN folded into Linear, heads packed into
# block-diagonal weights, one lane-dense (B_pad, 256) output.
# ---------------------------------------------------------------------------
def heads_kernel(gf_ref, w1_ref, b1_ref, w2_ref, b2_ref, w3_ref, b3_ref, o_ref):
    x = gf_ref[...]
    h1 = jnp.dot(x, w1_ref[...], preferred_element_type=jnp.float32) + b1_ref[...]
    h2 = jnp.dot(h1, w2_ref[...], preferred_element_type=jnp.float32) + b2_ref[...]
    o_ref[...] = jnp.dot(h2, w3_ref[...], preferred_element_type=jnp.float32) + b3_ref[...]


def _fold_bn_into_linear(w, b, gamma, beta, rmean, rvar):
    # eval-mode BN(xW + b) == x(W*scale) + ((b - rmean)*scale + beta)
    scale = gamma * jax.lax.rsqrt(rvar + EPS)            # (1, d)
    return w * scale, (b - rmean) * scale + beta


def _pack_heads(heads, out_pad):
    n = len(heads)
    d1 = heads[0]["w1"].shape[1]
    d2 = heads[0]["w2"].shape[1]

    w1s, b1s, w2s, b2s = [], [], [], []
    for h in heads:
        w1, b1 = _fold_bn_into_linear(h["w1"], h["b1"], h["g1"], h["be1"],
                                      h["rm1"], h["rv1"])
        w2, b2 = _fold_bn_into_linear(h["w2"], h["b2"], h["g2"], h["be2"],
                                      h["rm2"], h["rv2"])
        w1s.append(w1); b1s.append(b1); w2s.append(w2); b2s.append(b2)

    W1 = jnp.concatenate(w1s, axis=1)                    # (d_in, n*d1)
    B1 = jnp.concatenate(b1s, axis=1)                    # (1, n*d1)

    W2 = jnp.zeros((n * d1, n * d2), jnp.float32)        # block-diagonal
    for i, w2 in enumerate(w2s):
        W2 = W2.at[i * d1:(i + 1) * d1, i * d2:(i + 1) * d2].set(w2)
    B2 = jnp.concatenate(b2s, axis=1)                    # (1, n*d2)

    W3 = jnp.zeros((n * d2, out_pad), jnp.float32)       # heads at col offsets
    B3 = jnp.zeros((1, out_pad), jnp.float32)
    offsets, off = [], 0
    for i, h in enumerate(heads):
        c = h["w3"].shape[1]
        W3 = W3.at[i * d2:(i + 1) * d2, off:off + c].set(h["w3"])
        B3 = B3.at[:, off:off + c].set(h["b3"])
        offsets.append((off, c))
        off += c
    return (W1, B1, W2, B2, W3, B3), offsets


def heads_forward(gf, heads):
    B, d_in = gf.shape
    total_classes = sum(h["w3"].shape[1] for h in heads)
    out_pad = ((total_classes + 127) // 128) * 128        # lane-dense output
    b_pad = ((max(B, 8) + 7) // 8) * 8                    # sublane-dense rows

    packed, offsets = _pack_heads(heads, out_pad)
    gf_pad = jnp.pad(gf, ((0, b_pad - B), (0, 0)))

    n_h1 = packed[0].shape[1]
    n_h2 = packed[2].shape[1]
    flops = 2 * b_pad * (d_in * n_h1 + n_h1 * n_h2 + n_h2 * out_pad)
    bytes_accessed = (sum(int(a.size) * 4 for a in (gf_pad,) + packed)
                      + b_pad * out_pad * 4)

    vm = pl.BlockSpec(memory_space=pltpu.MemorySpace.VMEM)
    out = pl.pallas_call(
        heads_kernel,
        out_shape=jax.ShapeDtypeStruct((b_pad, out_pad), jnp.float32),
        in_specs=[vm] * (1 + len(packed)),
        out_specs=vm,
        cost_estimate=pl.CostEstimate(flops=flops, transcendentals=0,
                                      bytes_accessed=bytes_accessed),
    )(gf_pad, *packed)
    return tuple(out[:B, off:off + c] for off, c in offsets)


# ---------------------------------------------------------------------------
# Full forward
# ---------------------------------------------------------------------------
def cnn_model_forward(x, stem_w, stem_b, head_g, head_v, head_c):
    global_feat = fused_stem_pool(x, stem_w, stem_b)          # (B, global_dim)
    grapheme_out, vowel_out, consonant_out = heads_forward(
        global_feat, [head_g, head_v, head_c])
    return grapheme_out, vowel_out, consonant_out


# ---------------------------------------------------------------------------
# Parameter initialization (deterministic, synthetic)
# ---------------------------------------------------------------------------
def init_head_params(key, input_dim, d1, d2, classes):
    ks = jax.random.split(key, 8)
    f32 = jnp.float32

    def lin(kw, kb, din, dout):
        w = jax.random.normal(kw, (din, dout), f32) * (1.0 / jnp.sqrt(din))
        b = jax.random.normal(kb, (1, dout), f32) * 0.01
        return w, b

    def bn(kbn, dim):
        k1, k2, k3, k4 = jax.random.split(kbn, 4)   # independent keys for rm/rv
        g = 1.0 + 0.05 * jax.random.normal(k1, (1, dim), f32)
        be = 0.05 * jax.random.normal(k2, (1, dim), f32)
        rm = 0.05 * jax.random.normal(k3, (1, dim), f32)
        rv = 1.0 + 0.1 * jnp.abs(jax.random.normal(k4, (1, dim), f32))
        return g, be, rm, rv

    w1, b1 = lin(ks[0], ks[1], input_dim, d1)
    g1, be1, rm1, rv1 = bn(ks[2], d1)
    w2, b2 = lin(ks[3], ks[4], d1, d2)
    g2, be2, rm2, rv2 = bn(ks[5], d2)
    w3, b3 = lin(ks[6], ks[7], d2, classes)
    return dict(w1=w1, b1=b1, g1=g1, be1=be1, rm1=rm1, rv1=rv1,
                w2=w2, b2=b2, g2=g2, be2=be2, rm2=rm2, rv2=rv2,
                w3=w3, b3=b3)


if __name__ == "__main__":
    # Small shapes consistent with the module (global_dim 2048 -> 64,
    # head hidden dims 1024/512 -> 32/16; class counts kept exact).
    B, CIN, H, W = 2, 4, 16, 16
    GLOBAL_DIM, LIN1, LIN2 = 64, 32, 16

    key = jax.random.PRNGKey(0)
    kx, kw, kb, kg, kv, kc = jax.random.split(key, 6)

    x = jax.random.normal(kx, (B, CIN, H, W), jnp.float32)
    stem_w = jax.random.normal(kw, (CIN, GLOBAL_DIM), jnp.float32) * 0.2
    stem_b = jax.random.normal(kb, (GLOBAL_DIM,), jnp.float32) * 0.01

    head_g = init_head_params(kg, GLOBAL_DIM, LIN1, LIN2, 168)
    head_v = init_head_params(kv, GLOBAL_DIM, LIN1, LIN2, 11)
    head_c = init_head_params(kc, GLOBAL_DIM, LIN1, LIN2, 7)

    fwd = jax.jit(cnn_model_forward)
    g_out, v_out, c_out = fwd(x, stem_w, stem_b, head_g, head_v, head_c)
    jax.block_until_ready((g_out, v_out, c_out))

    assert g_out.shape == (B, 168) and v_out.shape == (B, 11) and c_out.shape == (B, 7)
    assert jnp.all(jnp.isfinite(g_out)) and jnp.all(jnp.isfinite(v_out)) and jnp.all(jnp.isfinite(c_out))
    print("KERNEL_OK")
</pallas_src>

<mosaic_0001>
module attributes {stable_mosaic.version = 11 : i64} {
  func.func @stem_pool_kernel(%arg0: i32, %arg1: i32, %arg2: memref<1x4x128xf32, #tpu.memory_space<vmem>>, %arg3: memref<64x4xf32, #tpu.memory_space<vmem>>, %arg4: memref<64x1xf32, #tpu.memory_space<vmem>>, %arg5: memref<1x64x1xf32, #tpu.memory_space<vmem>>, %arg6: memref<64x1xf32, #tpu.memory_space<vmem>>, %arg7: memref<64x1xf32, #tpu.memory_space<vmem>>) attributes {dimension_semantics = [#tpu.dimension_semantics<parallel>, #tpu.dimension_semantics<arbitrary>], iteration_bounds = array<i64: 2, 2>, scalar_prefetch = 0 : i64, scratch_operands = 2 : i64, tpu.core_type = #tpu.core_type<tc>, window_params = [{transform_indices = @transform_0, window_bounds = array<i64: 1, 4, 128>}, {pipeline_mode = #tpu.pipeline_mode<synchronous>, transform_indices = @transform_1, window_bounds = array<i64: 64, 4>}, {pipeline_mode = #tpu.pipeline_mode<synchronous>, transform_indices = @transform_2, window_bounds = array<i64: 64, 1>}, {transform_indices = @transform_3, window_bounds = array<i64: 1, 64, 1>}]} {
    %c0_i32 = arith.constant 0 : i32
    %0 = arith.cmpi eq, %arg1, %c0_i32 : i32
    %1 = arith.extui %0 : i1 to i32
    %c0_i32_0 = arith.constant 0 : i32
    %2 = arith.cmpi ne, %1, %c0_i32_0 : i32
    scf.if %2 {
      %cst_18 = arith.constant 0.000000e+00 : f32
      %51 = vector.broadcast %cst_18 : f32 to vector<64x1xf32>
      %c0_19 = arith.constant 0 : index
      %c0_20 = arith.constant 0 : index
      %52 = vector.load %arg6[%c0_19, %c0_20] : memref<64x1xf32, #tpu.memory_space<vmem>>, vector<64x1xf32>
      tpu.vector_store %arg6[%c0_19, %c0_20], %51 {strides = array<i32>} : memref<64x1xf32, #tpu.memory_space<vmem>>, vector<64x1xf32>,
      %cst_21 = arith.constant 0xFF800000 : f32
      %53 = vector.broadcast %cst_21 : f32 to vector<64x1xf32>
      %c0_22 = arith.constant 0 : index
      %c0_23 = arith.constant 0 : index
      %54 = vector.load %arg7[%c0_22, %c0_23] : memref<64x1xf32, #tpu.memory_space<vmem>>, vector<64x1xf32>
      tpu.vector_store %arg7[%c0_22, %c0_23], %53 {strides = array<i32>} : memref<64x1xf32, #tpu.memory_space<vmem>>, vector<64x1xf32>,
    } else {
    }
    %c0 = arith.constant 0 : index
    %c0_1 = arith.constant 0 : index
    %c0_2 = arith.constant 0 : index
    %3 = vector.load %arg2[%c0, %c0_1, %c0_2] : memref<1x4x128xf32, #tpu.memory_space<vmem>>, vector<1x4x128xf32>
    %4 = vector.shape_cast %3 : vector<1x4x128xf32> to vector<4x128xf32>
    %c0_3 = arith.constant 0 : index
    %c0_4 = arith.constant 0 : index
    %5 = vector.load %arg3[%c0_3, %c0_4] : memref<64x4xf32, #tpu.memory_space<vmem>>, vector<64x4xf32>
    %6 = vector.extract_strided_slice %5 {offsets = [0, 0], sizes = [64, 1], strides = [1, 1]} : vector<64x4xf32> to vector<64x1xf32>
    %7 = vector.extract_strided_slice %4 {offsets = [0, 0], sizes = [1, 128], strides = [1, 1]} : vector<4x128xf32> to vector<1x128xf32>
    %8 = vector.broadcast %6 : vector<64x1xf32> to vector<64x128xf32>
    %9 = vector.broadcast %7 : vector<1x128xf32> to vector<64x128xf32>
    %10 = arith.mulf %8, %9 : vector<64x128xf32>
    %11 = vector.extract_strided_slice %5 {offsets = [0, 1], sizes = [64, 1], strides = [1, 1]} : vector<64x4xf32> to vector<64x1xf32>
    %12 = vector.extract_strided_slice %4 {offsets = [1, 0], sizes = [1, 128], strides = [1, 1]} : vector<4x128xf32> to vector<1x128xf32>
    %13 = vector.broadcast %11 : vector<64x1xf32> to vector<64x128xf32>
    %14 = vector.broadcast %12 : vector<1x128xf32> to vector<64x128xf32>
    %15 = arith.mulf %13, %14 : vector<64x128xf32>
    %16 = arith.addf %10, %15 : vector<64x128xf32>
    %17 = vector.extract_strided_slice %5 {offsets = [0, 2], sizes = [64, 1], strides = [1, 1]} : vector<64x4xf32> to vector<64x1xf32>
    %18 = vector.extract_strided_slice %4 {offsets = [2, 0], sizes = [1, 128], strides = [1, 1]} : vector<4x128xf32> to vector<1x128xf32>
    %19 = vector.broadcast %17 : vector<64x1xf32> to vector<64x128xf32>
    %20 = vector.broadcast %18 : vector<1x128xf32> to vector<64x128xf32>
    %21 = arith.mulf %19, %20 : vector<64x128xf32>
    %22 = arith.addf %16, %21 : vector<64x128xf32>
    %23 = vector.extract_strided_slice %5 {offsets = [0, 3], sizes = [64, 1], strides = [1, 1]} : vector<64x4xf32> to vector<64x1xf32>
    %24 = vector.extract_strided_slice %4 {offsets = [3, 0], sizes = [1, 128], strides = [1, 1]} : vector<4x128xf32> to vector<1x128xf32>
    %25 = vector.broadcast %23 : vector<64x1xf32> to vector<64x128xf32>
    %26 = vector.broadcast %24 : vector<1x128xf32> to vector<64x128xf32>
    %27 = arith.mulf %25, %26 : vector<64x128xf32>
    %28 = arith.addf %22, %27 : vector<64x128xf32>
    %c0_5 = arith.constant 0 : index
    %c0_6 = arith.constant 0 : index
    %29 = vector.load %arg4[%c0_5, %c0_6] : memref<64x1xf32, #tpu.memory_space<vmem>>, vector<64x1xf32>
    %30 = vector.broadcast %29 : vector<64x1xf32> to vector<64x128xf32>
    %31 = arith.addf %28, %30 : vector<64x128xf32>
    %32 = arith.negf %31 : vector<64x128xf32>
    %33 = math.exp %32 : vector<64x128xf32>
    %cst = arith.constant 1.000000e+00 : f32
    %34 = vector.broadcast %cst : f32 to vector<64x128xf32>
    %35 = arith.addf %34, %33 : vector<64x128xf32>
    %36 = arith.divf %34, %35 : vector<64x128xf32>
    %37 = arith.mulf %31, %36 : vector<64x128xf32>
    %c0_7 = arith.constant 0 : index
    %c0_8 = arith.constant 0 : index
    %38 = vector.load %arg6[%c0_7, %c0_8] : memref<64x1xf32, #tpu.memory_space<vmem>>, vector<64x1xf32>
    %cst_9 = arith.constant dense<0.000000e+00> : vector<64xf32>
    %39 = vector.multi_reduction <add>, %37, %cst_9 [1] : vector<64x128xf32> to vector<64xf32>
    %40 = vector.shape_cast %39 : vector<64xf32> to vector<64x1xf32>
    %41 = arith.addf %38, %40 : vector<64x1xf32>
    %c0_10 = arith.constant 0 : index
    %c0_11 = arith.constant 0 : index
    %42 = vector.load %arg6[%c0_10, %c0_11] : memref<64x1xf32, #tpu.memory_space<vmem>>, vector<64x1xf32>
    tpu.vector_store %arg6[%c0_10, %c0_11], %41 {strides = array<i32>} : memref<64x1xf32, #tpu.memory_space<vmem>>, vector<64x1xf32>,
    %c0_12 = arith.constant 0 : index
    %c0_13 = arith.constant 0 : index
    %43 = vector.load %arg7[%c0_12, %c0_13] : memref<64x1xf32, #tpu.memory_space<vmem>>, vector<64x1xf32>
    %cst_14 = arith.constant dense<0xFF800000> : vector<64xf32>
    %44 = vector.multi_reduction <maximumf>, %37, %cst_14 [1] : vector<64x128xf32> to vector<64xf32>
    %45 = vector.shape_cast %44 : vector<64xf32> to vector<64x1xf32>
    %46 = arith.maximumf %43, %45 : vector<64x1xf32>
    %c0_15 = arith.constant 0 : index
    %c0_16 = arith.constant 0 : index
    %47 = vector.load %arg7[%c0_15, %c0_16] : memref<64x1xf32, #tpu.memory_space<vmem>>, vector<64x1xf32>
    tpu.vector_store %arg7[%c0_15, %c0_16], %46 {strides = array<i32>} : memref<64x1xf32, #tpu.memory_space<vmem>>, vector<64x1xf32>,
    %c1_i32 = arith.constant 1 : i32
    %48 = arith.cmpi eq, %arg1, %c1_i32 : i32
    %49 = arith.extui %48 : i1 to i32
    %c0_i32_17 = arith.constant 0 : i32
    %50 = arith.cmpi ne, %49, %c0_i32_17 : i32
    scf.if %50 {
      %c0_18 = arith.constant 0 : index
      %c0_19 = arith.constant 0 : index
      %51 = vector.load %arg6[%c0_18, %c0_19] : memref<64x1xf32, #tpu.memory_space<vmem>>, vector<64x1xf32>
      %cst_20 = arith.constant 3.906250e-03 : f32
      %52 = vector.broadcast %cst_20 : f32 to vector<64x1xf32>
      %53 = arith.mulf %51, %52 : vector<64x1xf32>
      %c0_21 = arith.constant 0 : index
      %c0_22 = arith.constant 0 : index
      %54 = vector.load %arg7[%c0_21, %c0_22] : memref<64x1xf32, #tpu.memory_space<vmem>>, vector<64x1xf32>
      %55 = arith.addf %53, %54 : vector<64x1xf32>
      %cst_23 = arith.constant 5.000000e-01 : f32
      %56 = vector.broadcast %cst_23 : f32 to vector<64x1xf32>
      %57 = arith.mulf %55, %56 : vector<64x1xf32>
      %c0_24 = arith.constant 0 : index
      %c0_25 = arith.constant 0 : index
      %c0_26 = arith.constant 0 : index
      %58 = vector.load %arg5[%c0_24, %c0_25, %c0_26] : memref<1x64x1xf32, #tpu.memory_space<vmem>>, vector<1x64x1xf32>
      %59 = vector.shape_cast %58 : vector<1x64x1xf32> to vector<64x1xf32>
      %60 = vector.shape_cast %57 : vector<64x1xf32> to vector<1x64x1xf32>
      tpu.vector_store %arg5[%c0_24, %c0_25, %c0_26], %60 {strides = array<i32>} : memref<1x64x1xf32, #tpu.memory_space<vmem>>, vector<1x64x1xf32>,
    } else {
    }
    return
  }
  func.func @transform_0(%arg0: i32, %arg1: i32) -> (i32, i32, i32) {
    %c0_i32 = arith.constant 0 : i32
    %c0_i32_0 = arith.constant 0 : i32
    return %arg0, %c0_i32, %arg1 : i32, i32, i32
  }
  func.func @transform_1(%arg0: i32, %arg1: i32) -> (i32, i32) {
    %c0_i32 = arith.constant 0 : i32
    %c0_i32_0 = arith.constant 0 : i32
    %c0_i32_1 = arith.constant 0 : i32
    return %c0_i32, %c0_i32_0 : i32, i32
  }
  func.func @transform_2(%arg0: i32, %arg1: i32) -> (i32, i32) {
    %c0_i32 = arith.constant 0 : i32
    %c0_i32_0 = arith.constant 0 : i32
    %c0_i32_1 = arith.constant 0 : i32
    return %c0_i32, %c0_i32_0 : i32, i32
  }
  func.func @transform_3(%arg0: i32, %arg1: i32) -> (i32, i32, i32) {
    %c0_i32 = arith.constant 0 : i32
    %c0_i32_0 = arith.constant 0 : i32
    %c0_i32_1 = arith.constant 0 : i32
    return %arg0, %c0_i32, %c0_i32_0 : i32, i32, i32
  }
}

module attributes {stable_mosaic.version = 11 : i64} {
  func.func @heads_kernel(%arg0: memref<8x64xf32, #tpu.memory_space<vmem>>, %arg1: memref<64x96xf32, #tpu.memory_space<vmem>>, %arg2: memref<1x96xf32, #tpu.memory_space<vmem>>, %arg3: memref<96x48xf32, #tpu.memory_space<vmem>>, %arg4: memref<1x48xf32, #tpu.memory_space<vmem>>, %arg5: memref<48x256xf32, #tpu.memory_space<vmem>>, %arg6: memref<1x256xf32, #tpu.memory_space<vmem>>, %arg7: memref<8x256xf32, #tpu.memory_space<vmem>>) attributes {dimension_semantics = [], scalar_prefetch = 0 : i64, scratch_operands = 0 : i64, tpu.core_type = #tpu.core_type<tc>} {
    %c0 = arith.constant 0 : index
    %c0_0 = arith.constant 0 : index
    %0 = vector.load %arg0[%c0, %c0_0] : memref<8x64xf32, #tpu.memory_space<vmem>>, vector<8x64xf32>
    %c0_1 = arith.constant 0 : index
    %c0_2 = arith.constant 0 : index
    %1 = vector.load %arg1[%c0_1, %c0_2] : memref<64x96xf32, #tpu.memory_space<vmem>>, vector<64x96xf32>
    %cst = arith.constant dense<0.000000e+00> : vector<8x96xf32>
    %2 = tpu.matmul %0, %1, %cst {dimension_numbers = #tpu.dot_dimension_numbers<[1], [0], [0], [1], [0, 0, 1, 1], [], []>} : vector<8x64xf32>, vector<64x96xf32>, vector<8x96xf32> -> vector<8x96xf32>
    %c0_3 = arith.constant 0 : index
    %c0_4 = arith.constant 0 : index
    %3 = vector.load %arg2[%c0_3, %c0_4] : memref<1x96xf32, #tpu.memory_space<vmem>>, vector<1x96xf32>
    %4 = vector.broadcast %3 : vector<1x96xf32> to vector<8x96xf32>
    %5 = arith.addf %2, %4 : vector<8x96xf32>
    %c0_5 = arith.constant 0 : index
    %c0_6 = arith.constant 0 : index
    %6 = vector.load %arg3[%c0_5, %c0_6] : memref<96x48xf32, #tpu.memory_space<vmem>>, vector<96x48xf32>
    %cst_7 = arith.constant dense<0.000000e+00> : vector<8x48xf32>
    %7 = tpu.matmul %5, %6, %cst_7 {dimension_numbers = #tpu.dot_dimension_numbers<[1], [0], [0], [1], [0, 0, 1, 1], [], []>} : vector<8x96xf32>, vector<96x48xf32>, vector<8x48xf32> -> vector<8x48xf32>
    %c0_8 = arith.constant 0 : index
    %c0_9 = arith.constant 0 : index
    %8 = vector.load %arg4[%c0_8, %c0_9] : memref<1x48xf32, #tpu.memory_space<vmem>>, vector<1x48xf32>
    %9 = vector.broadcast %8 : vector<1x48xf32> to vector<8x48xf32>
    %10 = arith.addf %7, %9 : vector<8x48xf32>
    %c0_10 = arith.constant 0 : index
    %c0_11 = arith.constant 0 : index
    %11 = vector.load %arg5[%c0_10, %c0_11] : memref<48x256xf32, #tpu.memory_space<vmem>>, vector<48x256xf32>
    %cst_12 = arith.constant dense<0.000000e+00> : vector<8x256xf32>
    %12 = tpu.matmul %10, %11, %cst_12 {dimension_numbers = #tpu.dot_dimension_numbers<[1], [0], [0], [1], [0, 0, 1, 1], [], []>} : vector<8x48xf32>, vector<48x256xf32>, vector<8x256xf32> -> vector<8x256xf32>
    %c0_13 = arith.constant 0 : index
    %c0_14 = arith.constant 0 : index
    %13 = vector.load %arg6[%c0_13, %c0_14] : memref<1x256xf32, #tpu.memory_space<vmem>>, vector<1x256xf32>
    %14 = vector.broadcast %13 : vector<1x256xf32> to vector<8x256xf32>
    %15 = arith.addf %12, %14 : vector<8x256xf32>
    %c0_15 = arith.constant 0 : index
    %c0_16 = arith.constant 0 : index
    %16 = vector.load %arg7[%c0_15, %c0_16] : memref<8x256xf32, #tpu.memory_space<vmem>>, vector<8x256xf32>
    tpu.vector_store %arg7[%c0_15, %c0_16], %15 {strides = array<i32>} : memref<8x256xf32, #tpu.memory_space<vmem>>, vector<8x256xf32>,
    return
  }
}

</mosaic_0001>

<bundles_post_ra>
// kernel: cnn_model_forward.2
= control target key start
LH: loop header
LB: loop body
LE: loop exit
PB: predicated region body
PF: predicated region fallthrough
CT: control target
= control target key end

     0   :  { %s924_s12 = smov 0   ;;  %s926_s13 = smov 0   ;;  %s1157_s0 = inlined_call_operand.vmem [shape: f32[2,4,256], index: 0, kind: input, shape index: {}]   ;;  %s1158_s1 = inlined_call_operand.vmem [shape: f32[64,4], index: 1, kind: input, shape index: {}]   ;;  %s1159_s2 = inlined_call_operand.vmem [shape: f32[64,1], index: 2, kind: input, shape index: {}]   ;;  %s1160_s3 = inlined_call_operand.vmem [shape: f32[2,64,1], index: 3, kind: output, shape index: {}]  }
   0x1   :  { %s928_s14 = smov 0   ;;  %s930_s15 = smov 0  }
   0x2   :  { %s932_s16 = smov 0  }
   0x3 LB: > { %s22_s17 = sadd.s32 1, %s888_s14  ;;  %s25_s18 = sadd.s32 1, %s892_s15  ;;  %s896_s16 = sphi %s932_s16, %s13_s16   ;;  %s892_s15 = sphi %s930_s15, %s1164_s15   ;;  %s888_s14 = sphi %s928_s14, %s1163_s14   ;;  %s884_s13 = sphi %s926_s13, %s1162_s13   ;;  %s880_s12 = sphi %s924_s12, %s1161_s12  }
   0x4   : > { %p23_p0 = scmp.ge.s32.totalorder %s22_s17, 2  ;;  %p753_p1 = scmp.ge.s32.totalorder %s896_s16, 1 }
   0x5   : > { %p154_p2 = scmp.lt.s32.totalorder %s896_s16, 5 }
   0x6   : > { %s1166_s17 = smov (%p23_p0, %s22_s17), 0  ;;  %s1168_s18 = smov (!%p23_p0, %s25_s18), %s892_s15 }
   0x7   : > { %p155_p3 = pnand %p753_p1, %p154_p2  ;;  %p27_p4 = scmp.ge.s32.totalorder %s1168_s18, 2 }
   0x8   : > { %p181_p5 = scmp.lt.s32.totalorder (!%p155_p3), %s884_s13, 1  ;;  %p183_p6 = scmp.lt.s32.totalorder (!%p155_p3), %s880_s12, 1 }
   0x9   : > { %s1170_s18 = smov (%p27_p4, %s1168_s18), 0  ;;  %158 = sbr.rel (%p155_p3) target bundleno = 450 (0x1c2), region = 32 }
   0xa   : > { %p758_p7 = scmp.ne.s32.totalorder (!%p155_p3), %s880_s12, 0 }
  0x10   : > { %s1172_s13 = smov (!%p181_p5, %s884_s13), 1  ;;  %197 = sbr.rel (%p758_p7) target bundleno = 27 (0x1b), region = 36 }
  0x11   : > { %s184_s19 = scalar_select %p183_p6, %s880_s12, 1 }
  0x12   : > { %s754_s20 = sshll.u32 %s1172_s13, 1  ;;  %s770_s21 = sshll.u32 %s1172_s13, 6  ;;  %vm198_vm0 = vcmask (!%p758_p7), 7168   ;;  %v898_v0 = vmov (!%p758_p7), 0.0   ;;  %v899_v1 = vmov (!%p758_p7), -inf  }
  0x13   : > { %s186_s22 = sadd.s32 %s754_s20, %s184_s19  ;;  %s961_s25 = scalar_lea.vmem %s1160_s3, %s770_s21  ;;  %199 = vst.msk [vmem:[#allocation2] sm:$0xff] (!%p758_p7), %vm198_vm0, %v898_v0  ;;  %200 = vst.msk [vmem:[#allocation2 + $0x8] sm:$0xff] (!%p758_p7), %vm198_vm0, %v898_v0 }
  0x14   : > { %s755_s26 = sshll.u32 %s186_s22, 2  ;;  %201 = vst.msk [vmem:[#allocation2 + $0x10] sm:$0xff] (!%p758_p7), %vm198_vm0, %v898_v0  ;;  %202 = vst.msk [vmem:[#allocation2 + $0x18] sm:$0xff] (!%p758_p7), %vm198_vm0, %v898_v0 }
  0x15   : > { %s966_s29 = scalar_lea.vmem %s1157_s0, %s755_s26  ;;  %203 = vst.msk [vmem:[#allocation2 + $0x20] sm:$0xff] (!%p758_p7), %vm198_vm0, %v898_v0  ;;  %204 = vst.msk [vmem:[#allocation2 + $0x28] sm:$0xff] (!%p758_p7), %vm198_vm0, %v898_v0 }
  0x16   : > { %205 = vst.msk [vmem:[#allocation2 + $0x30] sm:$0xff] (!%p758_p7), %vm198_vm0, %v898_v0  ;;  %206 = vst.msk [vmem:[#allocation2 + $0x38] sm:$0xff] (!%p758_p7), %vm198_vm0, %v898_v0 }
  0x17   : > { %207 = vst.msk [vmem:[#allocation3] sm:$0xff] %vm198_vm0, %v899_v1  ;;  %208 = vst.msk [vmem:[#allocation3 + $0x8] sm:$0xff] %vm198_vm0, %v899_v1 }
  0x18   : > { %209 = vst.msk [vmem:[#allocation3 + $0x10] sm:$0xff] %vm198_vm0, %v899_v1  ;;  %210 = vst.msk [vmem:[#allocation3 + $0x18] sm:$0xff] %vm198_vm0, %v899_v1 }
  0x19   : > { %211 = vst.msk [vmem:[#allocation3 + $0x20] sm:$0xff] %vm198_vm0, %v899_v1  ;;  %212 = vst.msk [vmem:[#allocation3 + $0x28] sm:$0xff] %vm198_vm0, %v899_v1 }
  0x1a   : > { %213 = vst.msk [vmem:[#allocation3 + $0x30] sm:$0xff] %vm198_vm0, %v899_v1  ;;  %214 = vst.msk [vmem:[#allocation3 + $0x38] sm:$0xff] %vm198_vm0, %v899_v1 }
  0x1b PF: > { %v218_v2 = vld [vmem:[%s1158_s1 + $0x10] sm:$0xff]  ;;  %v216_v3 = vld [vmem:[%s1158_s1] sm:$0xff]  ;;  %v900_v4 = vmov 1   ;;  %v901_v5 = vmov 0   ;;  %v219_v6 = vld [vmem:[%s1158_s1 + $0x18] sm:$0xff]  ;;  %v902_v10 = vmov 2   ;;  %v264_v22 = vlaneseq }
  0x1c   : > { %818 = vset.pattern.permute.xlu0 %v900_v4  ;;  %817 = vset.pattern.permute.xlu1 %v901_v5  ;;  %v221_v7 = vld [vmem:[%s1158_s1 + $0x28] sm:$0xff]  ;;  %v223_v8 = vld [vmem:[%s1158_s1 + $0x38] sm:$0xff]  ;;  %v220_v11 = vld [vmem:[%s1158_s1 + $0x20] sm:$0xff]  ;;  %v903_v13 = vmov 3   ;;  %vm576_vm1 = vcmask 7168   ;;  %p767_p8 = scmp.ne.s32.totalorder %s880_s12, 1 }
  0x1d   : > { %236 = vperm.xlu1 %817, %v218_v2   ;;  %277 = vperm.xlu0 %818, %v216_v3   ;;  %v217_v9 = vld [vmem:[%s1158_s1 + $0x8] sm:$0xff]  ;;  %v222_v12 = vld [vmem:[%s1158_s1 + $0x30] sm:$0xff]  ;;  %v436_v15 = vld [vmem:[%s1159_s2 + $0x20] sm:$0xff]  ;;  %v265_v23 = vshrl.u32 %v264_v22, 7 }
  0x1e   : > { %v433_v14 = vld [vmem:[%s1159_s2 + $0x8] sm:$0xff]  ;;  %v438_v16 = vld [vmem:[%s1159_s2 + $0x30] sm:$0xff]  ;;  %v432_v17 = vld [vmem:[%s1159_s2] sm:$0xff] }
  0x1f   : > { %v434_v18 = vld [vmem:[%s1159_s2 + $0x10] sm:$0xff]  ;;  %v435_v19 = vld [vmem:[%s1159_s2 + $0x18] sm:$0xff]  ;;  %v437_v20 = vld [vmem:[%s1159_s2 + $0x28] sm:$0xff]  ;;  %v310_v24 = vsub.s32 1, %v265_v23  ;;  %v266_v25 = vsub.s32 0, %v265_v23  ;;  %v362_v62 = vsub.s32 2, %v265_v23 }
  0x20   : > { %v439_v21 = vld [vmem:[%s1159_s2 + $0x38] sm:$0xff]  ;;  %v215_v27 = vld [vmem:[%s966_s29] sm:$0xf] }
  0x21   : > { %241 = vperm.xlu1 %817, %v219_v6   ;;  %289 = vperm.xlu0 %818, %v219_v6   ;;  %v1036_v29 = vrot.slane %v215_v27, %v310_v24  ;;  %v1038_v30 = vrot.slane %v215_v27, %v266_v25 }
  0x25   : > { %251 = vperm.xlu1 %817, %v221_v7   ;;  %297 = vperm.xlu0 %818, %v221_v7  }
  0x29   : > { %261 = vperm.xlu1 %817, %v223_v8   ;;  %305 = vperm.xlu0 %818, %v223_v8  }
  0x2d   : > { %819 = vset.pattern.permute.xlu1 %v900_v4  ;;  %821 = vset.pattern.permute.xlu0 %v902_v10 }
  0x2e   : > { %281 = vperm.xlu1 %819, %v217_v9   ;;  %333 = vperm.xlu0 %821, %v217_v9  }
  0x32   : > { %285 = vperm.xlu1 %819, %v218_v2   ;;  %345 = vperm.xlu0 %821, %v220_v11  }
  0x36   : > { %293 = vperm.xlu1 %819, %v220_v11   ;;  %353 = vperm.xlu0 %821, %v222_v12  }
  0x3a   : > { %301 = vperm.xlu1 %819, %v222_v12   ;;  %822 = vset.pattern.permute.xlu0 %v903_v13 }
  0x3b   : > { %381 = vperm.xlu0 %822, %v216_v3  }
  0x3e   : > { %820 = vset.pattern.permute.xlu1 %v902_v10 }
  0x3f   : > { %329 = vperm.xlu1 %820, %v216_v3   ;;  %393 = vperm.xlu0 %822, %v219_v6  }
  0x43   : > { %337 = vperm.xlu1 %820, %v218_v2   ;;  %401 = vperm.xlu0 %822, %v221_v7  }
  0x47   : > { %341 = vperm.xlu1 %820, %v219_v6   ;;  %409 = vperm.xlu0 %822, %v223_v8  }
  0x4b   : > { %349 = vperm.xlu1 %820, %v221_v7   ;;  %824 = vset.pattern.permute.xlu0 %v901_v5 }
  0x4c   : > { %226 = vperm.xlu0 %824, %v216_v3   ;;  %v414_v3 = vsub.s32 3, %v265_v23 }
  0x4f   : > { %357 = vperm.xlu1 %820, %v223_v8  }
  0x50   : > { %231 = vperm.xlu0 %824, %v217_v9  }
  0x53   : > { %823 = vset.pattern.permute.xlu1 %v903_v13 }
  0x54   : > { %385 = vperm.xlu1 %823, %v217_v9   ;;  %246 = vperm.xlu0 %824, %v220_v11   ;;  %v1067_v9 = vrot.slane %v215_v27, %v414_v3 }
  0x58   : > { %389 = vperm.xlu1 %823, %v218_v2   ;;  %256 = vperm.xlu0 %824, %v222_v12   ;;  %v1063_v2 = vrot.slane %v215_v27, %v362_v62 }
  0x5c   : > { %397 = vperm.xlu1 %823, %v220_v11   ;;  %447 = vperm.xlu0 %824, %v433_v14  }
  0x60   : > { %405 = vperm.xlu1 %823, %v222_v12   ;;  %462 = vperm.xlu0 %824, %v436_v15  }
  0x64   : > { %825 = vset.pattern.permute.xlu1 %v901_v5  ;;  %472 = vperm.xlu0 %824, %v438_v16  }
  0x65   : > { %442 = vperm.xlu1 %825, %v432_v17  }
  0x69   : > { %452 = vperm.xlu1 %825, %v434_v18  }
  0x6d   : > { %457 = vperm.xlu1 %825, %v435_v19  }
  0x71   : > { %467 = vperm.xlu1 %825, %v437_v20  }
  0x75   : > { %477 = vperm.xlu1 %825, %v439_v21  }
  0x9c   : > { %v1033_v26 = vpop.permute.xlu1 %236  ;;  %v278_v28 = vpop.permute.xlu0 %277 }
  0x9d   : > { %v312_v19 = vmul.f32 %v1036_v29, %v278_v28 }
  0xa0   : > { %v242_v31 = vpop.permute.xlu1 %241  ;;  %v290_v32 = vpop.permute.xlu0 %289 }
  0xa1   : > { %v271_v33 = vmul.f32 %v1038_v30, %v242_v31  ;;  %v315_v34 = vmul.f32 %v1036_v29, %v290_v32 }
  0xa3   : > { %v1042_v35 = vadd.f32 %v315_v34, %v271_v33 }
  0xa4   : > { %v252_v36 = vpop.permute.xlu1 %251  ;;  %v298_v37 = vpop.permute.xlu0 %297 }
  0xa5   : > { %v273_v38 = vmul.f32 %v1038_v30, %v252_v36  ;;  %v317_v39 = vmul.f32 %v1036_v29, %v298_v37 }
  0xa7   : > { %v1046_v40 = vadd.f32 %v317_v39, %v273_v38 }
  0xa8   : > { %v262_v41 = vpop.permute.xlu1 %261  ;;  %v306_v42 = vpop.permute.xlu0 %305 }
  0xa9   : > { %v275_v43 = vmul.f32 %v1038_v30, %v262_v41  ;;  %v319_v44 = vmul.f32 %v1036_v29, %v306_v42 }
  0xab   : > { %v1050_v45 = vadd.f32 %v319_v44, %v275_v43 }
  0xad   : > { %v282_v46 = vpop.permute.xlu1 %281  ;;  %v334_v47 = vpop.permute.xlu0 %333 }
  0xae   : > { %v313_v1 = vmul.f32 %v1036_v29, %v282_v46  ;;  %v365_v8 = vmul.f32 %v1063_v2, %v334_v47  ;;  %v270_v47 = vmul.f32 %v1038_v30, %v1033_v26 }
  0xb1   : > { %v286_v48 = vpop.permute.xlu1 %285  ;;  %v346_v49 = vpop.permute.xlu0 %345 }
  0xb2   : > { %v368_v20 = vmul.f32 %v1063_v2, %v346_v49  ;;  %v314_v38 = vmul.f32 %v1036_v29, %v286_v48 }
  0xb5   : > { %v294_v50 = vpop.permute.xlu1 %293  ;;  %v354_v51 = vpop.permute.xlu0 %353 }
  0xb6   : > { %v316_v11 = vmul.f32 %v1036_v29, %v294_v50  ;;  %v370_v36 = vmul.f32 %v1063_v2, %v354_v51 }
  0xb9   : > { %v302_v52 = vpop.permute.xlu1 %301 }
  0xba   : > { %v382_v53 = vpop.permute.xlu0 %381  ;;  %v318_v21 = vmul.f32 %v1036_v29, %v302_v52  ;;  %v322_v52 = vadd.f32 %v314_v38, %v270_v47 }
  0xbb   : > { %v416_v49 = vmul.f32 %v1067_v9, %v382_v53 }
  0xbe   : > { %v330_v54 = vpop.permute.xlu1 %329  ;;  %v1052_v55 = vpop.permute.xlu0 %393 }
  0xbf   : > { %v364_v34 = vmul.f32 %v1063_v2, %v330_v54  ;;  %v419_v26 = vmul.f32 %v1067_v9, %v1052_v55 }
  0xc2   : > { %v338_v56 = vpop.permute.xlu1 %337  ;;  %v1054_v57 = vpop.permute.xlu0 %401 }
  0xc3   : > { %v366_v50 = vmul.f32 %v1063_v2, %v338_v56 }
  0xc5   : > { %v374_v3 = vadd.f32 %v366_v50, %v322_v52 }
  0xc6   : > { %v342_v58 = vpop.permute.xlu1 %341  ;;  %v1056_v59 = vpop.permute.xlu0 %409 }
  0xc7   : > { %v367_v51 = vmul.f32 %v1063_v2, %v342_v58 }
  0xca   : > { %v1058_v60 = vpop.permute.xlu1 %349 }
  0xcb   : > { %v227_v61 = vpop.permute.xlu0 %226  ;;  %v369_v56 = vmul.f32 %v1063_v2, %v1058_v60 }
  0xcc   : > { %v268_v14 = vmul.f32 %v1038_v30, %v227_v61 }
  0xce   : > { %v1060_v63 = vpop.permute.xlu1 %357  ;;  %v320_v23 = vadd.f32 %v312_v19, %v268_v14 }
  0xcf   : > { %v232_v0 = vpop.permute.xlu0 %231 }
  0xd0   : > { %v269_v4 = vmul.f32 %v1038_v30, %v232_v0  ;;  %v372_v42 = vadd.f32 %v364_v34, %v320_v23 }
  0xd2   : > { %v321_v5 = vadd.f32 %v313_v1, %v269_v4  ;;  %v424_v62 = vadd.f32 %v416_v49, %v372_v42 }
  0xd3   : > { %v386_v6 = vpop.permute.xlu1 %385  ;;  %v247_v7 = vpop.permute.xlu0 %246 }
  0xd4   : > { %v272_v10 = vmul.f32 %v1038_v30, %v247_v7  ;;  %v417_v12 = vmul.f32 %v1067_v9, %v386_v6  ;;  %v373_v13 = vadd.f32 %v365_v8, %v321_v5 }
  0xd6   : > { %v324_v17 = vadd.f32 %v316_v11, %v272_v10  ;;  %v425_v22 = vadd.f32 %v417_v12, %v373_v13  ;;  %v421_v10 = vmul.f32 %v1067_v9, %v1054_v57  ;;  %v377_v12 = vadd.f32 %v369_v56, %v1046_v40 }
  0xd7   : > { %v390_v15 = vpop.permute.xlu1 %389  ;;  %v257_v16 = vpop.permute.xlu0 %256  ;;  %v423_v57 = vmul.f32 %v1067_v9, %v1056_v59 }
  0xd8   : > { %v274_v18 = vmul.f32 %v1038_v30, %v257_v16  ;;  %v376_v33 = vadd.f32 %v368_v20, %v324_v17  ;;  %v418_v54 = vmul.f32 %v1067_v9, %v390_v15  ;;  %v375_v30 = vadd.f32 %v367_v51, %v1042_v35 }
  0xd9   : > { %v371_v35 = vmul.f32 %v1063_v2, %v1060_v63  ;;  %v429_v19 = vadd.f32 %v421_v10, %v377_v12  ;;  %v587_v12 = vld [vmem:[#allocation3 + $0x10] sm:$0xff] }
  0xda   : > { %v326_v27 = vadd.f32 %v318_v21, %v274_v18  ;;  %v426_v5 = vadd.f32 %v418_v54, %v374_v3  ;;  %v427_v11 = vadd.f32 %v419_v26, %v375_v30  ;;  %v550_v26 = vld [vmem:[#allocation2 + $0x30] sm:$0xff]  ;;  %v544_v30 = vld [vmem:[#allocation2] sm:$0xff] }
  0xdb   : > { %v398_v24 = vpop.permute.xlu1 %397  ;;  %v448_v25 = vpop.permute.xlu0 %447  ;;  %v379_v16 = vadd.f32 %v371_v35, %v1050_v45 }
  0xdc   : > { %v420_v31 = vmul.f32 %v1067_v9, %v398_v24  ;;  %v1078_v32 = vadd.f32 %v448_v25, %v425_v22  ;;  %v378_v46 = vadd.f32 %v370_v36, %v326_v27 }
  0xdd   : > { %v431_v23 = vadd.f32 %v423_v57, %v379_v16 }
  0xde   : > { %v760_v28 = vmul.f32 -1.442695, %v1078_v32  ;;  %v428_v37 = vadd.f32 %v420_v31, %v376_v33 }
  0xdf   : > { %v406_v39 = vpop.permute.xlu1 %405  ;;  %v463_v41 = vpop.permute.xlu0 %462 }
  0xe0   : > { %826 = vpow2.f32 %v760_v28  ;;  %v422_v43 = vmul.f32 %v1067_v9, %v406_v39  ;;  %v1085_v44 = vadd.f32 %v463_v41, %v428_v37 }
  0xe2   : > { %v763_v29 = vmul.f32 -1.442695, %v1085_v44  ;;  %v430_v48 = vadd.f32 %v422_v43, %v378_v46 }
  0xe3   : > { %v473_v61 = vpop.permute.xlu0 %472 }
  0xe4   : > { %828 = vpow2.f32 %v763_v29  ;;  %v486_v0 = vadd.f32 %v473_v61, %v430_v48  ;;  %v443_v1 = vpop.permute.xlu1 %442  ;;  %v545_v61 = vld [vmem:[#allocation2 + $0x8] sm:$0xff] }
  0xe5   : > { %v480_v4 = vadd.f32 %v443_v1, %v424_v62  ;;  %v548_v1 = vld [vmem:[#allocation2 + $0x20] sm:$0xff] }
  0xe6   : > { %v765_v53 = vmul.f32 -1.442695, %v486_v0 }
  0xe7   : > { %v759_v58 = vmul.f32 -1.442695, %v480_v4 }
  0xe8   : > { %830 = vpow2.f32 %v765_v53  ;;  %v453_v6 = vpop.permute.xlu1 %452 }
  0xe9   : > { %832 = vpow2.f32 %v759_v58  ;;  %v482_v7 = vadd.f32 %v453_v6, %v426_v5  ;;  %v585_v6 = vld [vmem:[#allocation3] sm:$0xff] }
  0xea   : > { %v827_v8 = vpop.eup %826 }
  0xeb   : > { %v513_v55 = vadd.f32 1.0, %v827_v8  ;;  %v761_v13 = vmul.f32 -1.442695, %v482_v7  ;;  %v546_v8 = vld [vmem:[#allocation2 + $0x10] sm:$0xff] }
  0xec   : > { %v458_v14 = vpop.permute.xlu1 %457 }
  0xed   : > { %834 = vrcp.f32 %v513_v55  ;;  %v483_v60 = vadd.f32 %v458_v14, %v427_v11 }
  0xee   : > { %v829_v15 = vpop.eup %828  ;;  %836 = vpow2.f32 %v761_v13  ;;  %v547_v13 = vld [vmem:[#allocation2 + $0x18] sm:$0xff] }
  0xef   : > { %v516_v17 = vadd.f32 1.0, %v829_v15  ;;  %v762_v18 = vmul.f32 -1.442695, %v483_v60  ;;  %v589_v15 = vld [vmem:[#allocation3 + $0x20] sm:$0xff] }
  0xf0   : > { %v468_v20 = vpop.permute.xlu1 %467 }
  0xf1   : > { %838 = vrcp.f32 %v516_v17  ;;  %v485_v40 = vadd.f32 %v468_v20, %v429_v19  ;;  %v549_v19 = vld [vmem:[#allocation2 + $0x28] sm:$0xff]  ;;  %v591_v20 = vld [vmem:[#allocation3 + $0x30] sm:$0xff] }
  0xf2   : > { %v831_v21 = vpop.eup %830  ;;  %840 = vpow2.f32 %v762_v18 }
  0xf3   : > { %v833_v63 = vpop.eup %832  ;;  %v518_v2 = vadd.f32 1.0, %v831_v21  ;;  %v764_v22 = vmul.f32 -1.442695, %v485_v40 }
  0xf4   : > { %v512_v24 = vadd.f32 1.0, %v833_v63  ;;  %v478_v25 = vpop.permute.xlu1 %477 }
  0xf5   : > { %842 = vrcp.f32 %v518_v2  ;;  %v487_v27 = vadd.f32 %v478_v25, %v431_v23  ;;  %v551_v2 = vld [vmem:[#allocation2 + $0x38] sm:$0xff] }
  0xf6   : > { %844 = vrcp.f32 %v512_v24  ;;  %v586_v24 = vld [vmem:[#allocation3 + $0x8] sm:$0xff] }
  0xf7   : > { %v835_v45 = vpop.eup %834  ;;  %846 = vpow2.f32 %v764_v22  ;;  %v766_v31 = vmul.f32 -1.442695, %v487_v27 }
  0xf8   : > { %v837_v33 = vpop.eup %836  ;;  %v537_v34 = vmul.f32 %v835_v45, %v1078_v32  ;;  %v588_v45 = vld [vmem:[#allocation3 + $0x18] sm:$0xff] }
  0xf9   : > { %v514_v59 = vadd.f32 1.0, %v837_v33  ;;  %848 = vpow2.f32 %v766_v31 }
  0xfa   : > { %554 = vadd.xlane.f32.xlu1 %v537_v34 }
  0xfb   : > { %v839_v9 = vpop.eup %838  ;;  %850 = vrcp.f32 %v514_v59 }
  0xfc   : > { %v841_v36 = vpop.eup %840  ;;  %v540_v28 = vmul.f32 %v839_v9, %v1085_v44 }
  0xfd   : > { %v515_v37 = vadd.f32 1.0, %v841_v36  ;;  %v592_v36 = vld [vmem:[#allocation3 + $0x38] sm:$0xff] }
  0xfe   : > { %560 = vadd.xlane.f32.xlu1 %v540_v28 }
  0xff   : > { %v843_v38 = vpop.eup %842  ;;  %852 = vrcp.f32 %v515_v37 }
 0x100   : > { %v845_v39 = vpop.eup %844  ;;  %v542_v41 = vmul.f32 %v843_v38, %v486_v0 }
 0x101   : > { %v847_v42 = vpop.eup %846  ;;  %v536_v43 = vmul.f32 %v845_v39, %v480_v4 }
 0x102   : > { %v517_v46 = vadd.f32 1.0, %v847_v42  ;;  %564 = vadd.xlane.f32.xlu1 %v542_v41 }
 0x103   : > { %v849_v47 = vpop.eup %848  ;;  %552 = vadd.xlane.f32.xlu0 %v536_v43 }
 0x104   : > { %854 = vrcp.f32 %v517_v46  ;;  %v519_v32 = vadd.f32 1.0, %v849_v47 }
 0x105   : > { %v851_v49 = vpop.eup %850 }
 0x106   : > { %856 = vrcp.f32 %v519_v32  ;;  %593 = vmax.xlane.f32.xlu1 %v536_v43  ;;  %v538_v50 = vmul.f32 %v851_v49, %v482_v7 }
 0x108   : > { %556 = vadd.xlane.f32.xlu0 %v538_v50 }
 0x109   : > { %v853_v44 = vpop.eup %852 }
 0x10a   : > { %597 = vmax.xlane.f32.xlu1 %v538_v50  ;;  %v539_v51 = vmul.f32 %v853_v44, %v483_v60 }
 0x10c   : > { %558 = vadd.xlane.f32.xlu0 %v539_v51 }
 0x10e   : > { %v855_v29 = vpop.eup %854  ;;  %601 = vmax.xlane.f32.xlu1 %v540_v28 }
 0x10f   : > { %v541_v48 = vmul.f32 %v855_v29, %v485_v40 }
 0x110   : > { %v857_v52 = vpop.eup %856 }
 0x111   : > { %562 = vadd.xlane.f32.xlu0 %v541_v48  ;;  %v543_v54 = vmul.f32 %v857_v52, %v487_v27 }
 0x112   : > { %605 = vmax.xlane.f32.xlu1 %v542_v41 }
 0x115   : > { %566 = vadd.xlane.f32.xlu0 %v543_v54 }
 0x119   : > { %595 = vmax.xlane.f32.xlu0 %v537_v34  ;;  %v590_v34 = vld [vmem:[#allocation3 + $0x28] sm:$0xff] }
 0x11d   : > { %599 = vmax.xlane.f32.xlu0 %v539_v51 }
 0x121   : > { %603 = vmax.xlane.f32.xlu0 %v541_v48 }
 0x125   : > { %607 = vmax.xlane.f32.xlu0 %v543_v54 }
 0x187   : > { %v555_v62 = vpop.xlane.xlu1 %554 }
 0x188   : > { %v569_v0 = vadd.f32 %v555_v62, %v545_v61 }
 0x18a   : > { %578 = vst.msk [vmem:[#allocation2 + $0x8] sm:$0xff] %vm576_vm1, %v569_v0 }
 0x18b   : > { %v561_v3 = vpop.xlane.xlu1 %560 }
 0x18c   : > { %v572_v4 = vadd.f32 %v561_v3, %v548_v1 }
 0x18e   : > { %581 = vst.msk [vmem:[#allocation2 + $0x20] sm:$0xff] %vm576_vm1, %v572_v4 }
 0x18f   : > { %v565_v53 = vpop.xlane.xlu1 %564 }
 0x190   : > { %v574_v56 = vadd.f32 %v565_v53, %v550_v26  ;;  %v553_v58 = vpop.xlane.xlu0 %552 }
 0x191   : > { %v568_v5 = vadd.f32 %v553_v58, %v544_v30  ;;  %v630_v41 = vld [vmem:[#allocation2 + $0x8] sm:$0xff] (!%p767_p8) }
 0x192   : > { %583 = vst.msk [vmem:[#allocation2 + $0x30] sm:$0xff] %vm576_vm1, %v574_v56  ;;  %v638_v43 = vmul.f32 (!%p767_p8), 0.00390625, %v630_v41 }
 0x193   : > { %577 = vst.msk [vmem:[#allocation2] sm:$0xff] %vm576_vm1, %v568_v5  ;;  %v594_v7 = vpop.xlane.xlu1 %593 }
 0x194   : > { %v609_v10 = vmax.f32 %v585_v6, %v594_v7 }
 0x195   : > { %v557_v11 = vpop.xlane.xlu0 %556  ;;  %v633_v51 = vld [vmem:[#allocation2 + $0x20] sm:$0xff] (!%p767_p8) }
 0x196   : > { %617 = vst.msk [vmem:[#allocation3] sm:$0xff] %vm576_vm1, %v609_v10  ;;  %v570_v35 = vadd.f32 %v557_v11, %v546_v8  ;;  %v641_v54 = vmul.f32 (!%p767_p8), 0.00390625, %v633_v51 }
 0x197   : > { %v598_v55 = vpop.xlane.xlu1 %597 }
 0x198   : > { %579 = vst.msk [vmem:[#allocation2 + $0x10] sm:$0xff] %vm576_vm1, %v570_v35  ;;  %v611_v14 = vmax.f32 %v587_v12, %v598_v55 }
 0x199   : > { %v559_v60 = vpop.xlane.xlu0 %558  ;;  %v635_v4 = vld [vmem:[#allocation2 + $0x30] sm:$0xff] (!%p767_p8) }
 0x19a   : > { %619 = vst.msk [vmem:[#allocation3 + $0x10] sm:$0xff] %vm576_vm1, %v611_v14  ;;  %v571_v16 = vadd.f32 %v559_v60, %v547_v13  ;;  %v629_v38 = vld [vmem:[#allocation2] sm:$0xff] (!%p767_p8)  ;;  %v643_v10 = vmul.f32 (!%p767_p8), 0.00390625, %v635_v4 }
 0x19b   : > { %v602_v17 = vpop.xlane.xlu1 %601  ;;  %v637_v42 = vmul.f32 (!%p767_p8), 0.00390625, %v629_v38 }
 0x19c   : > { %580 = vst.msk [vmem:[#allocation2 + $0x18] sm:$0xff] %vm576_vm1, %v571_v16  ;;  %v613_v18 = vmax.f32 %v589_v15, %v602_v17 }
 0x19d   : > { %v645_v39 = vld [vmem:[#allocation3] sm:$0xff] (!%p767_p8) }
 0x19e   : > { %621 = vst.msk [vmem:[#allocation3 + $0x20] sm:$0xff] %vm576_vm1, %v613_v18  ;;  %v563_v57 = vpop.xlane.xlu0 %562  ;;  %v653_v29 = vadd.f32 (!%p767_p8), %v645_v39, %v637_v42 }
 0x19f   : > { %v573_v40 = vadd.f32 %v563_v57, %v549_v19  ;;  %v606_v21 = vpop.xlane.xlu1 %605  ;;  %v631_v47 = vld [vmem:[#allocation2 + $0x10] sm:$0xff] (!%p767_p8) }
 0x1a0   : > { %v615_v63 = vmax.f32 %v591_v20, %v606_v21  ;;  %v639_v49 = vmul.f32 (!%p767_p8), 0.00390625, %v631_v47  ;;  %v661_v30 = vmul.f32 (!%p767_p8), 0.5, %v653_v29 }
 0x1a1   : > { %582 = vst.msk [vmem:[#allocation2 + $0x28] sm:$0xff] %vm576_vm1, %v573_v40  ;;  %v647_v32 = vld [vmem:[#allocation3 + $0x10] sm:$0xff] (!%p767_p8) }
 0x1a2   : > { %623 = vst.msk [vmem:[#allocation3 + $0x30] sm:$0xff] %vm576_vm1, %v615_v63  ;;  %v567_v22 = vpop.xlane.xlu0 %566  ;;  %v655_v1 = vadd.f32 (!%p767_p8), %v647_v32, %v639_v49  ;;  %669 = vst.msk [vmem:[%s961_s25] sm:$0xff] (!%p767_p8), %vm576_vm1, %v661_v30 }
 0x1a3   : > { %v575_v23 = vadd.f32 %v567_v22, %v551_v2  ;;  %v632_v50 = vld [vmem:[#allocation2 + $0x18] sm:$0xff] (!%p767_p8) }
 0x1a4   : > { %v640_v52 = vmul.f32 (!%p767_p8), 0.00390625, %v632_v50  ;;  %v663_v7 = vmul.f32 (!%p767_p8), 0.5, %v655_v1 }
 0x1a5   : > { %584 = vst.msk [vmem:[#allocation2 + $0x38] sm:$0xff] %vm576_vm1, %v575_v23  ;;  %v649_v61 = vld [vmem:[#allocation3 + $0x20] sm:$0xff] (!%p767_p8) }
 0x1a6   : > { %v596_v25 = vpop.xlane.xlu0 %595  ;;  %v657_v58 = vadd.f32 (!%p767_p8), %v649_v61, %v641_v54  ;;  %671 = vst.msk [vmem:[%s961_s25 + $0x10] sm:$0xff] (!%p767_p8), %vm576_vm1, %v663_v7 }
 0x1a7   : > { %v610_v27 = vmax.f32 %v586_v24, %v596_v25 }
 0x1a8   : > { %v634_v62 = vld [vmem:[#allocation2 + $0x28] sm:$0xff] (!%p767_p8)  ;;  %v665_v35 = vmul.f32 (!%p767_p8), 0.5, %v657_v58 }
 0x1a9   : > { %618 = vst.msk [vmem:[#allocation3 + $0x8] sm:$0xff] %vm576_vm1, %v610_v27  ;;  %v642_v3 = vmul.f32 (!%p767_p8), 0.00390625, %v634_v62  ;;  %v651_v5 = vld [vmem:[#allocation3 + $0x30] sm:$0xff] (!%p767_p8) }
 0x1aa   : > { %v600_v31 = vpop.xlane.xlu0 %599  ;;  %v659_v13 = vadd.f32 (!%p767_p8), %v651_v5, %v643_v10  ;;  %673 = vst.msk [vmem:[%s961_s25 + $0x20] sm:$0xff] (!%p767_p8), %vm576_vm1, %v665_v35 }
 0x1ab   : > { %v612_v33 = vmax.f32 %v588_v45, %v600_v31 }
 0x1ac   : > { %v636_v26 = vld [vmem:[#allocation2 + $0x38] sm:$0xff] (!%p767_p8)  ;;  %v667_v60 = vmul.f32 (!%p767_p8), 0.5, %v659_v13 }
 0x1ad   : > { %620 = vst.msk [vmem:[#allocation3 + $0x18] sm:$0xff] %vm576_vm1, %v612_v33  ;;  %v644_v11 = vmul.f32 (!%p767_p8), 0.00390625, %v636_v26 }
 0x1ae   : > { %v604_v59 = vpop.xlane.xlu0 %603  ;;  %675 = vst.msk [vmem:[%s961_s25 + $0x30] sm:$0xff] (!%p767_p8), %vm576_vm1, %v667_v60 }
 0x1af   : > { %v614_v9 = vmax.f32 %v590_v34, %v604_v59  ;;  %628 = sbr.rel (%p767_p8) target bundleno = 450 (0x1c2), region = 40 }
 0x1b0   : > { %v646_v46 = vld [vmem:[#allocation3 + $0x8] sm:$0xff] (!%p767_p8) }
 0x1b1   : > { %622 = vst.msk [vmem:[#allocation3 + $0x28] sm:$0xff] %vm576_vm1, %v614_v9  ;;  %v654_v48 = vadd.f32 (!%p767_p8), %v646_v46, %v638_v43 }
 0x1b2   : > { %v608_v28 = vpop.xlane.xlu0 %607 }
 0x1b3   : > { %v616_v37 = vmax.f32 %v592_v36, %v608_v28  ;;  %v662_v53 = vmul.f32 (!%p767_p8), 0.5, %v654_v48 }
 0x1b4   : > { %v648_v44 = vld [vmem:[#allocation3 + $0x18] sm:$0xff] (!%p767_p8) }
 0x1b5   : > { %624 = vst.msk [vmem:[#allocation3 + $0x38] sm:$0xff] %vm576_vm1, %v616_v37  ;;  %v656_v56 = vadd.f32 (!%p767_p8), %v648_v44, %v640_v52  ;;  %670 = vst.msk [vmem:[%s961_s25 + $0x8] sm:$0xff] (!%p767_p8), %vm576_vm1, %v662_v53 }
 0x1b7   : > { %v664_v12 = vmul.f32 0.5, %v656_v56 }
 0x1b8   : > { %v650_v0 = vld [vmem:[#allocation3 + $0x28] sm:$0xff] }
 0x1b9   : > { %v658_v8 = vadd.f32 %v650_v0, %v642_v3  ;;  %672 = vst.msk [vmem:[%s961_s25 + $0x18] sm:$0xff] %vm576_vm1, %v664_v12 }
 0x1bb   : > { %v666_v55 = vmul.f32 0.5, %v658_v8 }
 0x1bc   : > { %v652_v6 = vld [vmem:[#allocation3 + $0x38] sm:$0xff] }
 0x1bd   : > { %v660_v14 = vadd.f32 %v652_v6, %v644_v11  ;;  %674 = vst.msk [vmem:[%s961_s25 + $0x28] sm:$0xff] %vm576_vm1, %v666_v55 }
 0x1bf   : > { %v668_v15 = vmul.f32 0.5, %v660_v14 }
 0x1c1   : > { %676 = vst.msk [vmem:[%s961_s25 + $0x38] sm:$0xff] %vm576_vm1, %v668_v15 }
 0x1c2 PF: > { %s13_s16 = sadd.s32 1, %s896_s16   ;;  %s1161_s12 = smov %s888_s14 }
 0x1c3   : > { %p10_p9 = scmp.ge.s32.totalorder %s13_s16, 6   ;;  %s1162_s13 = smov %s892_s15 }
 0x1c4   : > { %s1163_s14 = smov %s1166_s17  ;;  %s1164_s15 = smov %s1170_s18 }
 0x1c5   :  { %12 = sbr.rel (!%p10_p9) target bundleno = 3 (0x3), region = 70 }

// kernel: cnn_model_forward.3
= control target key start
LH: loop header
LB: loop body
LE: loop exit
PB: predicated region body
PF: predicated region fallthrough
CT: control target
= control target key end

     0   :  { %v432_v0 = vmov 0.0|0.0   ;;  %vm433_vm0 = vmmov 0   ;;  %v434_v4 = vmov 0.0   ;;  %vm42_vm1 = vcmask 523264   ;;  %s589_s1 = inlined_call_operand.vmem [shape: f32[64,96], index: 1, kind: input, shape index: {}]   ;;  %s590_s3 = inlined_call_operand.vmem [shape: f32[96,48], index: 3, kind: input, shape index: {}]   ;;  %s591_s0 = inlined_call_operand.vmem [shape: f32[8,64], index: 0, kind: input, shape index: {}]   ;;  %s592_s5 = inlined_call_operand.vmem [shape: f32[48,256], index: 5, kind: input, shape index: {}]   ;;  %s593_s2 = inlined_call_operand.vmem [shape: f32[1,96], index: 2, kind: input, shape index: {}]   ;;  %s594_s4 = inlined_call_operand.vmem [shape: f32[1,48], index: 4, kind: input, shape index: {}]   ;;  %s595_s6 = inlined_call_operand.vmem [shape: f32[1,256], index: 6, kind: input, shape index: {}]   ;;  %s596_s7 = inlined_call_operand.vmem [shape: f32[8,256], index: 7, kind: output, shape index: {}]  }
   0x1   :  { %387 = vmatprep.subr.bf16.mxu0 %v432_v0  ;;  %v27_v1 = vld [vmem:[%s589_s1] sm:$0xff]  ;;  %v28_v2 = vld [vmem:[%s589_s1 + $0x8] sm:$0xff]  ;;  %v29_v3 = vld [vmem:[%s589_s1 + $0x10] sm:$0xff]  ;;  %357 = vmatprep.mubr.msk.f32.mxu0 %vm433_vm0, %v434_v4  ;;  %vm135_vm2 = vcmask 785408   ;;  %vm233_vm3 = vcmask 392192   ;;  %v223_v59 = vlaneseq }
   0x2   :  { %v388_v5 = vpack.c.bf16 %v28_v2, %v27_v1  ;;  %v30_v6 = vld [vmem:[%s589_s1 + $0x18] sm:$0xff]  ;;  %399 = vmatprep.subr.bf16.mxu1 %v432_v0  ;;  %384 = vmatprep.mubr.msk.f32.mxu1 %vm433_vm0, %v434_v4  ;;  %v116_v8 = vld [vmem:[%s590_s3] sm:$0xff]  ;;  %v117_v9 = vld [vmem:[%s590_s3 + $0x8] sm:$0xff] }
   0x3   :  { %v391_v7 = vpack.c.bf16 %v30_v6, %v29_v3  ;;  %v118_v10 = vld [vmem:[%s590_s3 + $0x10] sm:$0xff]  ;;  %v31_v11 = vld [vmem:[%s589_s1 + $0x20] sm:$0xff]  ;;  %v32_v12 = vld [vmem:[%s589_s1 + $0x28] sm:$0xff]  ;;  %v400_v13 = vpack.c.bf16 %v117_v9, %v116_v8  ;;  %v224_v60 = vshrl.u32 %v223_v59, 7 }
   0x4   :  { %389 = vmatpush3.bf16.msra.mxu0 %v388_v5  ;;  %v119_v14 = vld [vmem:[%s590_s3 + $0x18] sm:$0xff]  ;;  %v394_v16 = vpack.c.bf16 %v32_v12, %v31_v11  ;;  %v120_v17 = vld [vmem:[%s590_s3 + $0x20] sm:$0xff]  ;;  %v121_v18 = vld [vmem:[%s590_s3 + $0x28] sm:$0xff] }
   0x5   :  { %390 = vmatprep.subr.bf16.mxu0 %v432_v0  ;;  %401 = vmatpush3.bf16.msra.mxu1 %v400_v13  ;;  %v403_v15 = vpack.c.bf16 %v119_v14, %v118_v10  ;;  %v33_v19 = vld [vmem:[%s589_s1 + $0x30] sm:$0xff]  ;;  %v34_v20 = vld [vmem:[%s589_s1 + $0x38] sm:$0xff]  ;;  %v406_v21 = vpack.c.bf16 %v121_v18, %v120_v17  ;;  %v26_v26 = vld [vmem:[%s591_s0] sm:$0xff]  ;;  %v225_v61 = vsub.s32 0, %v224_v60  ;;  %v229_v63 = vsub.s32 1, %v224_v60 }
   0x6   :  { %402 = vmatprep.subr.bf16.mxu1 %v432_v0  ;;  %v397_v22 = vpack.c.bf16 %v34_v20, %v33_v19  ;;  %v122_v23 = vld [vmem:[%s590_s3 + $0x30] sm:$0xff]  ;;  %v123_v24 = vld [vmem:[%s590_s3 + $0x38] sm:$0xff]  ;;  %v124_v27 = vld [vmem:[%s590_s3 + $0x40] sm:$0xff] }
   0x7   :  { %v409_v25 = vpack.c.bf16 %v123_v24, %v122_v23  ;;  %v125_v28 = vld [vmem:[%s590_s3 + $0x48] sm:$0xff]  ;;  %v126_v30 = vld [vmem:[%s590_s3 + $0x50] sm:$0xff]  ;;  %v127_v31 = vld [vmem:[%s590_s3 + $0x58] sm:$0xff] }
   0x8   :  { %392 = vmatpush3.bf16.msra.mxu0 %v391_v7  ;;  %v412_v29 = vpack.c.bf16 %v125_v28, %v124_v27  ;;  %v415_v32 = vpack.c.bf16 %v127_v31, %v126_v30  ;;  %v210_v33 = vld [vmem:[%s592_s5 + $0x8] sm:$0xff]  ;;  %v212_v34 = vld [vmem:[%s592_s5 + $0x18] sm:$0xff]  ;;  %v209_v35 = vld [vmem:[%s592_s5] sm:$0xff] }
   0x9   :  { %393 = vmatprep.subr.bf16.mxu0 %v432_v0  ;;  %404 = vmatpush3.bf16.msra.mxu1 %v403_v15  ;;  %v417_v36 = vpack.c.bf16 %v212_v34, %v210_v33  ;;  %v211_v37 = vld [vmem:[%s592_s5 + $0x10] sm:$0xff]  ;;  %v214_v38 = vld [vmem:[%s592_s5 + $0x28] sm:$0xff]  ;;  %v216_v39 = vld [vmem:[%s592_s5 + $0x38] sm:$0xff] }
   0xa   :  { %405 = vmatprep.subr.bf16.mxu1 %v432_v0  ;;  %v419_v40 = vpack.c.bf16 %v211_v37, %v209_v35  ;;  %v421_v41 = vpack.c.bf16 %v216_v39, %v214_v38  ;;  %v213_v42 = vld [vmem:[%s592_s5 + $0x20] sm:$0xff]  ;;  %v215_v43 = vld [vmem:[%s592_s5 + $0x30] sm:$0xff]  ;;  %v218_v44 = vld [vmem:[%s592_s5 + $0x48] sm:$0xff] }
   0xb   :  { %v220_v45 = vld [vmem:[%s592_s5 + $0x58] sm:$0xff]  ;;  %v423_v46 = vpack.c.bf16 %v215_v43, %v213_v42  ;;  %v314_v48 = vld [vmem:[%s593_s2] ss:$0 sm:$0xff]  ;;  %v219_v53 = vld [vmem:[%s592_s5 + $0x50] sm:$0xff] }
   0xc   :  { %395 = vmatpush3.bf16.msra.mxu0 %v394_v16  ;;  %v425_v47 = vpack.c.bf16 %v220_v45, %v218_v44  ;;  %v217_v52 = vld [vmem:[%s592_s5 + $0x40] sm:$0xff] }
   0xd   :  { %396 = vmatprep.subr.bf16.mxu0 %v432_v0  ;;  %407 = vmatpush3.bf16.msra.mxu1 %v406_v21  ;;  %v427_v54 = vpack.c.bf16 %v219_v53, %v217_v52  ;;  %v316_v55 = vld [vmem:[%s594_s4] ss:$0 sm:$0xff] }
   0xe   :  { %408 = vmatprep.subr.bf16.mxu1 %v432_v0  ;;  %v221_v62 = vld [vmem:[%s595_s6] sm:$0x3] }
   0xf   :  { %v230_v1 = vrot.slane %v221_v62, %v229_v63 }
  0x10   :  { %398 = vmatpush3.bf16.msra.mxu0 %v397_v22 }
  0x11   :  { %410 = vmatpush3.bf16.msra.mxu1 %v409_v25  ;;  %418 = vmatprep.subr.bf16.mxu0 %v417_v36 }
  0x12   :  { %411 = vmatprep.subr.bf16.mxu1 %v432_v0 }
  0x13   :  { %358 = vmatmul.mubr.msk.f32.vlgmr.msra.gmra.mrb[0].mxu0 %vm42_vm1, %v26_v26 }
  0x14   :  { %301 = vmatprep.mubr.f32.mxu0 %v434_v4  ;;  %420 = vmatpush1.bf16.msra.mxu0 %v419_v40 }
  0x15   :  { %413 = vmatpush3.bf16.msra.mxu1 %v412_v29  ;;  %422 = vmatprep.subr.bf16.mxu0 %v421_v41 }
  0x16   :  { %414 = vmatprep.subr.bf16.mxu1 %v432_v0  ;;  %v226_v0 = vrot.slane %v221_v62, %v225_v61 }
  0x18   :  { %424 = vmatpush1.bf16.msra.mxu0 %v423_v46 }
  0x19   :  { %416 = vmatpush3.bf16.msra.mxu1 %v415_v32  ;;  %426 = vmatprep.subr.bf16.mxu0 %v425_v47 }
  0x1c   :  { %428 = vmatpush1.bf16.msra.mxu0 %v427_v54 }
  0xe6   :  { %v112_v49 = vpop.f32.mrb[0].mxu0 }
  0xe7   :  { %v113_v50 = vadd.f32 %v314_v48, %v112_v49  ;;  %v359_v51 = vpop.f32.mrb[1].mxu0 }
  0xe9   :  { %385 = vmatmul.mubr.msk.f32.vlgmr.msra.gmra.mrb[0].mxu1 %vm135_vm2, %v113_v50 }
 0x1bc   :  { %v205_v56 = vpop.f32.mrb[0].mxu1 }
 0x1bd   :  { %v206_v57 = vadd.f32 %v316_v55, %v205_v56  ;;  %v386_v58 = vpop.f32.mrb[1].mxu1 }
 0x1bf   :  { %318 = vmatmul.mubr.msk.f32.vlgmr.msra.gmra.mrb[2].mxu0 %vm233_vm3, %v206_v57 }
 0x292   :  { %v303_v2 = vpop.f32.mrb[2].mxu0 }
 0x293   :  { %v304_v3 = vadd.f32 %v303_v2, %v226_v0  ;;  %v305_v4 = vpop.f32.mrb[3].mxu0 }
 0x294   :  { %v306_v5 = vadd.f32 %v305_v4, %v230_v1 }
 0x295   :  { %308 = vst [vmem:[%s596_s7] sm:$0xff] %v304_v3 }
 0x296   :  { %309 = vst [vmem:[%s596_s7 + $0x8] sm:$0xff] %v306_v5 }

</bundles_post_ra>
